<compile_context>
chip_gen: v6e
topology: v6e:2x2x1
jax: 0.10.0
libtpu: 0.0.40
codegen_flags: <defaults>
</compile_context>

<pallas_src>
import functools

import jax
import jax.numpy as jnp
from jax.experimental import pallas as pl
from jax.experimental.pallas import tpu as pltpu


def _round_up(x, m):
    return ((x + m - 1) // m) * m


def _gather_rows_kernel(eff_ref, table_ref, out_ref, row_buf, copy_sems, *,
                        rows_per_step):
    """Gather `rows_per_step` embedding rows for one batch chunk.

    eff_ref   : (B_pad,) int32 in SMEM (scalar prefetch) - effective label per row
    table_ref : (V, H) embedding table left in HBM (memory_space=pl.ANY)
    out_ref   : (rows_per_step, H) output block in VMEM
    row_buf   : (rows_per_step, H) VMEM scratch the per-row DMAs land in
    copy_sems : (rows_per_step,) DMA semaphores, one per in-flight row copy
    """
    chunk = pl.program_id(0)
    base = chunk * rows_per_step

    # Issue every per-row DMA up front so they overlap on the DMA engine.
    for r in range(rows_per_step):
        row_idx = eff_ref[base + r]
        pltpu.make_async_copy(
            table_ref.at[pl.ds(row_idx, 1), :],
            row_buf.at[pl.ds(r, 1), :],
            copy_sems.at[r],
        ).start()

    # Drain them all, then emit one lane-dense (rows, H) store to the output block.
    for r in range(rows_per_step):
        pltpu.make_async_copy(
            table_ref.at[pl.ds(0, 1), :],
            row_buf.at[pl.ds(r, 1), :],
            copy_sems.at[r],
        ).wait()

    out_ref[...] = row_buf[...]


def label_embed_pallas(labels, drop_mask, table, num_classes, *, rows_per_step=64):
    """labels: (B,) int, drop_mask: (B,) int (1 = drop to CFG id), table: (V, H).

    Returns (B, H) gathered embeddings with the CFG token-drop applied.
    """
    B = labels.shape[0]
    V, H = table.shape

    labels = labels.astype(jnp.int32)
    drop_mask = drop_mask.astype(jnp.int32)
    # token_drop folded into the wrapper: dropped labels -> CFG row (= num_classes).
    eff = jnp.where(drop_mask == 1, jnp.int32(num_classes), labels)
    # Keep DMA source indices in range.  (PyTorch nn.Embedding raises on an
    # out-of-range label; we clamp instead of faulting the DMA engine.)
    eff = jnp.clip(eff, 0, V - 1)

    # Batch chunking: rows/step is a multiple of 8 (sublane tile), capped at
    # rows_per_step; pad the batch so it divides evenly and slice afterwards.
    rows = _round_up(min(rows_per_step, B), 8)
    b_pad = _round_up(B, rows)
    eff_pad = jnp.pad(eff, (0, b_pad - B))      # padded rows gather row 0, dropped below
    num_chunks = b_pad // rows

    out_pad = pl.pallas_call(
        functools.partial(_gather_rows_kernel, rows_per_step=rows),
        out_shape=jax.ShapeDtypeStruct((b_pad, H), table.dtype),
        grid_spec=pltpu.PrefetchScalarGridSpec(
            num_scalar_prefetch=1,
            grid=(num_chunks,),
            in_specs=[pl.BlockSpec(memory_space=pl.ANY)],   # full table stays in HBM
            out_specs=pl.BlockSpec((rows, H), lambda c, eff: (c, 0)),
            scratch_shapes=[
                pltpu.VMEM((rows, H), table.dtype),
                pltpu.SemaphoreType.DMA((rows,)),
            ],
        ),
        compiler_params=pltpu.CompilerParams(
            dimension_semantics=("parallel",),   # v7x: shard batch chunks over 2 TCs
        ),
    )(eff_pad, table)
    return out_pad[:B]


class LabelEmbedderPallas:
    """JAX/Pallas port of LabelEmbedder (embedding lookup + CFG label dropout)."""

    def __init__(self, num_classes, hidden_size, dropout_prob, key):
        self.num_classes = num_classes
        self.dropout_prob = dropout_prob
        use_cfg_embedding = int(dropout_prob > 0)
        # nn.Embedding default init: N(0, 1)
        self.embedding_table = jax.random.normal(
            key, (num_classes + use_cfg_embedding, hidden_size), dtype=jnp.float32
        )

    def __call__(self, labels, train, rng=None, force_drop_ids=None):
        B = labels.shape[0]
        use_dropout = self.dropout_prob > 0
        if (train and use_dropout) or (force_drop_ids is not None):
            if force_drop_ids is None:
                # torch.rand(B) < dropout_prob, made deterministic via a PRNGKey.
                u = jax.random.uniform(rng, (B,))
                drop_mask = (u < self.dropout_prob).astype(jnp.int32)
            else:
                drop_mask = (force_drop_ids == 1).astype(jnp.int32)
        else:
            drop_mask = jnp.zeros((B,), dtype=jnp.int32)
        return label_embed_pallas(
            labels, drop_mask, self.embedding_table, self.num_classes
        )


if __name__ == "__main__":
    num_classes = 10
    hidden_size = 128
    dropout_prob = 0.1
    batch = 8

    root = jax.random.PRNGKey(0)
    k_table, k_labels, k_drop, k_labels2 = jax.random.split(root, 4)

    embedder = LabelEmbedderPallas(num_classes, hidden_size, dropout_prob, k_table)
    table = embedder.embedding_table

    labels = jax.random.randint(k_labels, (batch,), 0, num_classes, dtype=jnp.int32)

    # --- eval path (no dropout): must match a plain gather exactly -------------
    emb_eval = jax.block_until_ready(embedder(labels, train=False))
    ref_eval = jnp.take(table, labels, axis=0)
    assert emb_eval.shape == (batch, hidden_size)
    assert jnp.array_equal(emb_eval, ref_eval), "eval mismatch vs reference gather"

    # --- forced CFG drop: deterministic check of the token_drop path -----------
    force = jnp.array([1, 0, 1, 0, 1, 0, 0, 1], dtype=jnp.int32)
    emb_drop = jax.block_until_ready(
        embedder(labels, train=False, force_drop_ids=force)
    )
    eff_labels = jnp.where(force == 1, num_classes, labels)
    ref_drop = jnp.take(table, eff_labels, axis=0)
    assert jnp.array_equal(emb_drop, ref_drop), "forced-drop mismatch vs reference"

    # --- train path (random CFG dropout) just has to run ----------------------
    emb_train = jax.block_until_ready(embedder(labels, train=True, rng=k_drop))
    assert emb_train.shape == (batch, hidden_size)

    # --- multi-chunk / padded batch path (grid > 1 + batch padding) ------------
    big_batch = 20
    labels_big = jax.random.randint(
        k_labels2, (big_batch,), 0, num_classes, dtype=jnp.int32
    )
    emb_big = jax.block_until_ready(
        label_embed_pallas(
            labels_big,
            jnp.zeros((big_batch,), jnp.int32),
            table,
            num_classes,
            rows_per_step=8,
        )
    )
    ref_big = jnp.take(table, labels_big, axis=0)
    assert jnp.array_equal(emb_big, ref_big), "multi-chunk mismatch vs reference"

    print("KERNEL_OK")
</pallas_src>

<mosaic_0001>
module attributes {stable_mosaic.version = 11 : i64} {
  func.func @_gather_rows_kernel(%arg0: i32, %arg1: memref<8xi32, #tpu.memory_space<smem>>, %arg2: memref<11x128xf32, #tpu.memory_space<any>>, %arg3: memref<8x128xf32, #tpu.memory_space<vmem>>, %arg4: memref<8x128xf32, #tpu.memory_space<vmem>>, %arg5: memref<8x!tpu.dma_semaphore, #tpu.memory_space<semaphore_mem>>) attributes {dimension_semantics = [#tpu.dimension_semantics<parallel>], iteration_bounds = array<i64: 1>, scalar_prefetch = 1 : i64, scratch_operands = 2 : i64, tpu.core_type = #tpu.core_type<tc>, window_params = [{}, {transform_indices = @transform_1, window_bounds = array<i64: 8, 128>}]} {
    %c8_i32 = arith.constant 8 : i32
    %0 = arith.muli %arg0, %c8_i32 : i32
    %c0_i32 = arith.constant 0 : i32
    %1 = arith.addi %0, %c0_i32 : i32
    %2 = arith.index_cast %1 : i32 to index
    %3 = memref.load %arg1[%2] : memref<8xi32, #tpu.memory_space<smem>>
    %c0_i32_0 = arith.constant 0 : i32
    %c0_i32_1 = arith.constant 0 : i32
    %4 = tpu.memref_slice %arg2[%3, %c0_i32_1] : memref<11x128xf32, #tpu.memory_space<any>> -> memref<1x128xf32, #tpu.memory_space<any>>
    %c0_i32_2 = arith.constant 0 : i32
    %c0_i32_3 = arith.constant 0 : i32
    %5 = tpu.memref_slice %arg4[%c0_i32_2, %c0_i32_3] : memref<8x128xf32, #tpu.memory_space<vmem>> -> memref<1x128xf32, #tpu.memory_space<vmem>>
    %6 = tpu.memref_slice %arg5[%c0_i32_0] : memref<8x!tpu.dma_semaphore, #tpu.memory_space<semaphore_mem>> -> memref<1x!tpu.dma_semaphore, #tpu.memory_space<semaphore_mem>>
    %7 = tpu.memref_squeeze %6 : memref<1x!tpu.dma_semaphore, #tpu.memory_space<semaphore_mem>> -> memref<!tpu.dma_semaphore, #tpu.memory_space<semaphore_mem>>
    tpu.enqueue_dma source(%4 : memref<1x128xf32, #tpu.memory_space<any>>) target(%5 : memref<1x128xf32, #tpu.memory_space<vmem>>) target_semaphore(%7 : memref<!tpu.dma_semaphore, #tpu.memory_space<semaphore_mem>>)
    %c1_i32 = arith.constant 1 : i32
    %8 = arith.addi %0, %c1_i32 : i32
    %9 = arith.index_cast %8 : i32 to index
    %10 = memref.load %arg1[%9] : memref<8xi32, #tpu.memory_space<smem>>
    %c1_i32_4 = arith.constant 1 : i32
    %c0_i32_5 = arith.constant 0 : i32
    %11 = tpu.memref_slice %arg2[%10, %c0_i32_5] : memref<11x128xf32, #tpu.memory_space<any>> -> memref<1x128xf32, #tpu.memory_space<any>>
    %c1_i32_6 = arith.constant 1 : i32
    %c0_i32_7 = arith.constant 0 : i32
    %12 = tpu.memref_slice %arg4[%c1_i32_6, %c0_i32_7] : memref<8x128xf32, #tpu.memory_space<vmem>> -> memref<1x128xf32, #tpu.memory_space<vmem>>
    %13 = tpu.memref_slice %arg5[%c1_i32_4] : memref<8x!tpu.dma_semaphore, #tpu.memory_space<semaphore_mem>> -> memref<1x!tpu.dma_semaphore, #tpu.memory_space<semaphore_mem>>
    %14 = tpu.memref_squeeze %13 : memref<1x!tpu.dma_semaphore, #tpu.memory_space<semaphore_mem>> -> memref<!tpu.dma_semaphore, #tpu.memory_space<semaphore_mem>>
    tpu.enqueue_dma source(%11 : memref<1x128xf32, #tpu.memory_space<any>>) target(%12 : memref<1x128xf32, #tpu.memory_space<vmem>>) target_semaphore(%14 : memref<!tpu.dma_semaphore, #tpu.memory_space<semaphore_mem>>)
    %c2_i32 = arith.constant 2 : i32
    %15 = arith.addi %0, %c2_i32 : i32
    %16 = arith.index_cast %15 : i32 to index
    %17 = memref.load %arg1[%16] : memref<8xi32, #tpu.memory_space<smem>>
    %c2_i32_8 = arith.constant 2 : i32
    %c0_i32_9 = arith.constant 0 : i32
    %18 = tpu.memref_slice %arg2[%17, %c0_i32_9] : memref<11x128xf32, #tpu.memory_space<any>> -> memref<1x128xf32, #tpu.memory_space<any>>
    %c2_i32_10 = arith.constant 2 : i32
    %c0_i32_11 = arith.constant 0 : i32
    %19 = tpu.memref_slice %arg4[%c2_i32_10, %c0_i32_11] : memref<8x128xf32, #tpu.memory_space<vmem>> -> memref<1x128xf32, #tpu.memory_space<vmem>>
    %20 = tpu.memref_slice %arg5[%c2_i32_8] : memref<8x!tpu.dma_semaphore, #tpu.memory_space<semaphore_mem>> -> memref<1x!tpu.dma_semaphore, #tpu.memory_space<semaphore_mem>>
    %21 = tpu.memref_squeeze %20 : memref<1x!tpu.dma_semaphore, #tpu.memory_space<semaphore_mem>> -> memref<!tpu.dma_semaphore, #tpu.memory_space<semaphore_mem>>
    tpu.enqueue_dma source(%18 : memref<1x128xf32, #tpu.memory_space<any>>) target(%19 : memref<1x128xf32, #tpu.memory_space<vmem>>) target_semaphore(%21 : memref<!tpu.dma_semaphore, #tpu.memory_space<semaphore_mem>>)
    %c3_i32 = arith.constant 3 : i32
    %22 = arith.addi %0, %c3_i32 : i32
    %23 = arith.index_cast %22 : i32 to index
    %24 = memref.load %arg1[%23] : memref<8xi32, #tpu.memory_space<smem>>
    %c3_i32_12 = arith.constant 3 : i32
    %c0_i32_13 = arith.constant 0 : i32
    %25 = tpu.memref_slice %arg2[%24, %c0_i32_13] : memref<11x128xf32, #tpu.memory_space<any>> -> memref<1x128xf32, #tpu.memory_space<any>>
    %c3_i32_14 = arith.constant 3 : i32
    %c0_i32_15 = arith.constant 0 : i32
    %26 = tpu.memref_slice %arg4[%c3_i32_14, %c0_i32_15] : memref<8x128xf32, #tpu.memory_space<vmem>> -> memref<1x128xf32, #tpu.memory_space<vmem>>
    %27 = tpu.memref_slice %arg5[%c3_i32_12] : memref<8x!tpu.dma_semaphore, #tpu.memory_space<semaphore_mem>> -> memref<1x!tpu.dma_semaphore, #tpu.memory_space<semaphore_mem>>
    %28 = tpu.memref_squeeze %27 : memref<1x!tpu.dma_semaphore, #tpu.memory_space<semaphore_mem>> -> memref<!tpu.dma_semaphore, #tpu.memory_space<semaphore_mem>>
    tpu.enqueue_dma source(%25 : memref<1x128xf32, #tpu.memory_space<any>>) target(%26 : memref<1x128xf32, #tpu.memory_space<vmem>>) target_semaphore(%28 : memref<!tpu.dma_semaphore, #tpu.memory_space<semaphore_mem>>)
    %c4_i32 = arith.constant 4 : i32
    %29 = arith.addi %0, %c4_i32 : i32
    %30 = arith.index_cast %29 : i32 to index
    %31 = memref.load %arg1[%30] : memref<8xi32, #tpu.memory_space<smem>>
    %c4_i32_16 = arith.constant 4 : i32
    %c0_i32_17 = arith.constant 0 : i32
    %32 = tpu.memref_slice %arg2[%31, %c0_i32_17] : memref<11x128xf32, #tpu.memory_space<any>> -> memref<1x128xf32, #tpu.memory_space<any>>
    %c4_i32_18 = arith.constant 4 : i32
    %c0_i32_19 = arith.constant 0 : i32
    %33 = tpu.memref_slice %arg4[%c4_i32_18, %c0_i32_19] : memref<8x128xf32, #tpu.memory_space<vmem>> -> memref<1x128xf32, #tpu.memory_space<vmem>>
    %34 = tpu.memref_slice %arg5[%c4_i32_16] : memref<8x!tpu.dma_semaphore, #tpu.memory_space<semaphore_mem>> -> memref<1x!tpu.dma_semaphore, #tpu.memory_space<semaphore_mem>>
    %35 = tpu.memref_squeeze %34 : memref<1x!tpu.dma_semaphore, #tpu.memory_space<semaphore_mem>> -> memref<!tpu.dma_semaphore, #tpu.memory_space<semaphore_mem>>
    tpu.enqueue_dma source(%32 : memref<1x128xf32, #tpu.memory_space<any>>) target(%33 : memref<1x128xf32, #tpu.memory_space<vmem>>) target_semaphore(%35 : memref<!tpu.dma_semaphore, #tpu.memory_space<semaphore_mem>>)
    %c5_i32 = arith.constant 5 : i32
    %36 = arith.addi %0, %c5_i32 : i32
    %37 = arith.index_cast %36 : i32 to index
    %38 = memref.load %arg1[%37] : memref<8xi32, #tpu.memory_space<smem>>
    %c5_i32_20 = arith.constant 5 : i32
    %c0_i32_21 = arith.constant 0 : i32
    %39 = tpu.memref_slice %arg2[%38, %c0_i32_21] : memref<11x128xf32, #tpu.memory_space<any>> -> memref<1x128xf32, #tpu.memory_space<any>>
    %c5_i32_22 = arith.constant 5 : i32
    %c0_i32_23 = arith.constant 0 : i32
    %40 = tpu.memref_slice %arg4[%c5_i32_22, %c0_i32_23] : memref<8x128xf32, #tpu.memory_space<vmem>> -> memref<1x128xf32, #tpu.memory_space<vmem>>
    %41 = tpu.memref_slice %arg5[%c5_i32_20] : memref<8x!tpu.dma_semaphore, #tpu.memory_space<semaphore_mem>> -> memref<1x!tpu.dma_semaphore, #tpu.memory_space<semaphore_mem>>
    %42 = tpu.memref_squeeze %41 : memref<1x!tpu.dma_semaphore, #tpu.memory_space<semaphore_mem>> -> memref<!tpu.dma_semaphore, #tpu.memory_space<semaphore_mem>>
    tpu.enqueue_dma source(%39 : memref<1x128xf32, #tpu.memory_space<any>>) target(%40 : memref<1x128xf32, #tpu.memory_space<vmem>>) target_semaphore(%42 : memref<!tpu.dma_semaphore, #tpu.memory_space<semaphore_mem>>)
    %c6_i32 = arith.constant 6 : i32
    %43 = arith.addi %0, %c6_i32 : i32
    %44 = arith.index_cast %43 : i32 to index
    %45 = memref.load %arg1[%44] : memref<8xi32, #tpu.memory_space<smem>>
    %c6_i32_24 = arith.constant 6 : i32
    %c0_i32_25 = arith.constant 0 : i32
    %46 = tpu.memref_slice %arg2[%45, %c0_i32_25] : memref<11x128xf32, #tpu.memory_space<any>> -> memref<1x128xf32, #tpu.memory_space<any>>
    %c6_i32_26 = arith.constant 6 : i32
    %c0_i32_27 = arith.constant 0 : i32
    %47 = tpu.memref_slice %arg4[%c6_i32_26, %c0_i32_27] : memref<8x128xf32, #tpu.memory_space<vmem>> -> memref<1x128xf32, #tpu.memory_space<vmem>>
    %48 = tpu.memref_slice %arg5[%c6_i32_24] : memref<8x!tpu.dma_semaphore, #tpu.memory_space<semaphore_mem>> -> memref<1x!tpu.dma_semaphore, #tpu.memory_space<semaphore_mem>>
    %49 = tpu.memref_squeeze %48 : memref<1x!tpu.dma_semaphore, #tpu.memory_space<semaphore_mem>> -> memref<!tpu.dma_semaphore, #tpu.memory_space<semaphore_mem>>
    tpu.enqueue_dma source(%46 : memref<1x128xf32, #tpu.memory_space<any>>) target(%47 : memref<1x128xf32, #tpu.memory_space<vmem>>) target_semaphore(%49 : memref<!tpu.dma_semaphore, #tpu.memory_space<semaphore_mem>>)
    %c7_i32 = arith.constant 7 : i32
    %50 = arith.addi %0, %c7_i32 : i32
    %51 = arith.index_cast %50 : i32 to index
    %52 = memref.load %arg1[%51] : memref<8xi32, #tpu.memory_space<smem>>
    %c7_i32_28 = arith.constant 7 : i32
    %c0_i32_29 = arith.constant 0 : i32
    %53 = tpu.memref_slice %arg2[%52, %c0_i32_29] : memref<11x128xf32, #tpu.memory_space<any>> -> memref<1x128xf32, #tpu.memory_space<any>>
    %c7_i32_30 = arith.constant 7 : i32
    %c0_i32_31 = arith.constant 0 : i32
    %54 = tpu.memref_slice %arg4[%c7_i32_30, %c0_i32_31] : memref<8x128xf32, #tpu.memory_space<vmem>> -> memref<1x128xf32, #tpu.memory_space<vmem>>
    %55 = tpu.memref_slice %arg5[%c7_i32_28] : memref<8x!tpu.dma_semaphore, #tpu.memory_space<semaphore_mem>> -> memref<1x!tpu.dma_semaphore, #tpu.memory_space<semaphore_mem>>
    %56 = tpu.memref_squeeze %55 : memref<1x!tpu.dma_semaphore, #tpu.memory_space<semaphore_mem>> -> memref<!tpu.dma_semaphore, #tpu.memory_space<semaphore_mem>>
    tpu.enqueue_dma source(%53 : memref<1x128xf32, #tpu.memory_space<any>>) target(%54 : memref<1x128xf32, #tpu.memory_space<vmem>>) target_semaphore(%56 : memref<!tpu.dma_semaphore, #tpu.memory_space<semaphore_mem>>)
    %c0_i32_32 = arith.constant 0 : i32
    %c0_i32_33 = arith.constant 0 : i32
    %c0_i32_34 = arith.constant 0 : i32
    %57 = tpu.memref_slice %arg2[%c0_i32_33, %c0_i32_34] : memref<11x128xf32, #tpu.memory_space<any>> -> memref<1x128xf32, #tpu.memory_space<any>>
    %c0_i32_35 = arith.constant 0 : i32
    %c0_i32_36 = arith.constant 0 : i32
    %58 = tpu.memref_slice %arg4[%c0_i32_35, %c0_i32_36] : memref<8x128xf32, #tpu.memory_space<vmem>> -> memref<1x128xf32, #tpu.memory_space<vmem>>
    %59 = tpu.memref_slice %arg5[%c0_i32_32] : memref<8x!tpu.dma_semaphore, #tpu.memory_space<semaphore_mem>> -> memref<1x!tpu.dma_semaphore, #tpu.memory_space<semaphore_mem>>
    %60 = tpu.memref_squeeze %59 : memref<1x!tpu.dma_semaphore, #tpu.memory_space<semaphore_mem>> -> memref<!tpu.dma_semaphore, #tpu.memory_space<semaphore_mem>>
    tpu.wait_dma2 semaphore(%60 : memref<!tpu.dma_semaphore, #tpu.memory_space<semaphore_mem>>) src(%57 : memref<1x128xf32, #tpu.memory_space<any>>) dst(%58 : memref<1x128xf32, #tpu.memory_space<vmem>>)
    %c1_i32_37 = arith.constant 1 : i32
    %c0_i32_38 = arith.constant 0 : i32
    %c0_i32_39 = arith.constant 0 : i32
    %61 = tpu.memref_slice %arg2[%c0_i32_38, %c0_i32_39] : memref<11x128xf32, #tpu.memory_space<any>> -> memref<1x128xf32, #tpu.memory_space<any>>
    %c1_i32_40 = arith.constant 1 : i32
    %c0_i32_41 = arith.constant 0 : i32
    %62 = tpu.memref_slice %arg4[%c1_i32_40, %c0_i32_41] : memref<8x128xf32, #tpu.memory_space<vmem>> -> memref<1x128xf32, #tpu.memory_space<vmem>>
    %63 = tpu.memref_slice %arg5[%c1_i32_37] : memref<8x!tpu.dma_semaphore, #tpu.memory_space<semaphore_mem>> -> memref<1x!tpu.dma_semaphore, #tpu.memory_space<semaphore_mem>>
    %64 = tpu.memref_squeeze %63 : memref<1x!tpu.dma_semaphore, #tpu.memory_space<semaphore_mem>> -> memref<!tpu.dma_semaphore, #tpu.memory_space<semaphore_mem>>
    tpu.wait_dma2 semaphore(%64 : memref<!tpu.dma_semaphore, #tpu.memory_space<semaphore_mem>>) src(%61 : memref<1x128xf32, #tpu.memory_space<any>>) dst(%62 : memref<1x128xf32, #tpu.memory_space<vmem>>)
    %c2_i32_42 = arith.constant 2 : i32
    %c0_i32_43 = arith.constant 0 : i32
    %c0_i32_44 = arith.constant 0 : i32
    %65 = tpu.memref_slice %arg2[%c0_i32_43, %c0_i32_44] : memref<11x128xf32, #tpu.memory_space<any>> -> memref<1x128xf32, #tpu.memory_space<any>>
    %c2_i32_45 = arith.constant 2 : i32
    %c0_i32_46 = arith.constant 0 : i32
    %66 = tpu.memref_slice %arg4[%c2_i32_45, %c0_i32_46] : memref<8x128xf32, #tpu.memory_space<vmem>> -> memref<1x128xf32, #tpu.memory_space<vmem>>
    %67 = tpu.memref_slice %arg5[%c2_i32_42] : memref<8x!tpu.dma_semaphore, #tpu.memory_space<semaphore_mem>> -> memref<1x!tpu.dma_semaphore, #tpu.memory_space<semaphore_mem>>
    %68 = tpu.memref_squeeze %67 : memref<1x!tpu.dma_semaphore, #tpu.memory_space<semaphore_mem>> -> memref<!tpu.dma_semaphore, #tpu.memory_space<semaphore_mem>>
    tpu.wait_dma2 semaphore(%68 : memref<!tpu.dma_semaphore, #tpu.memory_space<semaphore_mem>>) src(%65 : memref<1x128xf32, #tpu.memory_space<any>>) dst(%66 : memref<1x128xf32, #tpu.memory_space<vmem>>)
    %c3_i32_47 = arith.constant 3 : i32
    %c0_i32_48 = arith.constant 0 : i32
    %c0_i32_49 = arith.constant 0 : i32
    %69 = tpu.memref_slice %arg2[%c0_i32_48, %c0_i32_49] : memref<11x128xf32, #tpu.memory_space<any>> -> memref<1x128xf32, #tpu.memory_space<any>>
    %c3_i32_50 = arith.constant 3 : i32
    %c0_i32_51 = arith.constant 0 : i32
    %70 = tpu.memref_slice %arg4[%c3_i32_50, %c0_i32_51] : memref<8x128xf32, #tpu.memory_space<vmem>> -> memref<1x128xf32, #tpu.memory_space<vmem>>
    %71 = tpu.memref_slice %arg5[%c3_i32_47] : memref<8x!tpu.dma_semaphore, #tpu.memory_space<semaphore_mem>> -> memref<1x!tpu.dma_semaphore, #tpu.memory_space<semaphore_mem>>
    %72 = tpu.memref_squeeze %71 : memref<1x!tpu.dma_semaphore, #tpu.memory_space<semaphore_mem>> -> memref<!tpu.dma_semaphore, #tpu.memory_space<semaphore_mem>>
    tpu.wait_dma2 semaphore(%72 : memref<!tpu.dma_semaphore, #tpu.memory_space<semaphore_mem>>) src(%69 : memref<1x128xf32, #tpu.memory_space<any>>) dst(%70 : memref<1x128xf32, #tpu.memory_space<vmem>>)
    %c4_i32_52 = arith.constant 4 : i32
    %c0_i32_53 = arith.constant 0 : i32
    %c0_i32_54 = arith.constant 0 : i32
    %73 = tpu.memref_slice %arg2[%c0_i32_53, %c0_i32_54] : memref<11x128xf32, #tpu.memory_space<any>> -> memref<1x128xf32, #tpu.memory_space<any>>
    %c4_i32_55 = arith.constant 4 : i32
    %c0_i32_56 = arith.constant 0 : i32
    %74 = tpu.memref_slice %arg4[%c4_i32_55, %c0_i32_56] : memref<8x128xf32, #tpu.memory_space<vmem>> -> memref<1x128xf32, #tpu.memory_space<vmem>>
    %75 = tpu.memref_slice %arg5[%c4_i32_52] : memref<8x!tpu.dma_semaphore, #tpu.memory_space<semaphore_mem>> -> memref<1x!tpu.dma_semaphore, #tpu.memory_space<semaphore_mem>>
    %76 = tpu.memref_squeeze %75 : memref<1x!tpu.dma_semaphore, #tpu.memory_space<semaphore_mem>> -> memref<!tpu.dma_semaphore, #tpu.memory_space<semaphore_mem>>
    tpu.wait_dma2 semaphore(%76 : memref<!tpu.dma_semaphore, #tpu.memory_space<semaphore_mem>>) src(%73 : memref<1x128xf32, #tpu.memory_space<any>>) dst(%74 : memref<1x128xf32, #tpu.memory_space<vmem>>)
    %c5_i32_57 = arith.constant 5 : i32
    %c0_i32_58 = arith.constant 0 : i32
    %c0_i32_59 = arith.constant 0 : i32
    %77 = tpu.memref_slice %arg2[%c0_i32_58, %c0_i32_59] : memref<11x128xf32, #tpu.memory_space<any>> -> memref<1x128xf32, #tpu.memory_space<any>>
    %c5_i32_60 = arith.constant 5 : i32
    %c0_i32_61 = arith.constant 0 : i32
    %78 = tpu.memref_slice %arg4[%c5_i32_60, %c0_i32_61] : memref<8x128xf32, #tpu.memory_space<vmem>> -> memref<1x128xf32, #tpu.memory_space<vmem>>
    %79 = tpu.memref_slice %arg5[%c5_i32_57] : memref<8x!tpu.dma_semaphore, #tpu.memory_space<semaphore_mem>> -> memref<1x!tpu.dma_semaphore, #tpu.memory_space<semaphore_mem>>
    %80 = tpu.memref_squeeze %79 : memref<1x!tpu.dma_semaphore, #tpu.memory_space<semaphore_mem>> -> memref<!tpu.dma_semaphore, #tpu.memory_space<semaphore_mem>>
    tpu.wait_dma2 semaphore(%80 : memref<!tpu.dma_semaphore, #tpu.memory_space<semaphore_mem>>) src(%77 : memref<1x128xf32, #tpu.memory_space<any>>) dst(%78 : memref<1x128xf32, #tpu.memory_space<vmem>>)
    %c6_i32_62 = arith.constant 6 : i32
    %c0_i32_63 = arith.constant 0 : i32
    %c0_i32_64 = arith.constant 0 : i32
    %81 = tpu.memref_slice %arg2[%c0_i32_63, %c0_i32_64] : memref<11x128xf32, #tpu.memory_space<any>> -> memref<1x128xf32, #tpu.memory_space<any>>
    %c6_i32_65 = arith.constant 6 : i32
    %c0_i32_66 = arith.constant 0 : i32
    %82 = tpu.memref_slice %arg4[%c6_i32_65, %c0_i32_66] : memref<8x128xf32, #tpu.memory_space<vmem>> -> memref<1x128xf32, #tpu.memory_space<vmem>>
    %83 = tpu.memref_slice %arg5[%c6_i32_62] : memref<8x!tpu.dma_semaphore, #tpu.memory_space<semaphore_mem>> -> memref<1x!tpu.dma_semaphore, #tpu.memory_space<semaphore_mem>>
    %84 = tpu.memref_squeeze %83 : memref<1x!tpu.dma_semaphore, #tpu.memory_space<semaphore_mem>> -> memref<!tpu.dma_semaphore, #tpu.memory_space<semaphore_mem>>
    tpu.wait_dma2 semaphore(%84 : memref<!tpu.dma_semaphore, #tpu.memory_space<semaphore_mem>>) src(%81 : memref<1x128xf32, #tpu.memory_space<any>>) dst(%82 : memref<1x128xf32, #tpu.memory_space<vmem>>)
    %c7_i32_67 = arith.constant 7 : i32
    %c0_i32_68 = arith.constant 0 : i32
    %c0_i32_69 = arith.constant 0 : i32
    %85 = tpu.memref_slice %arg2[%c0_i32_68, %c0_i32_69] : memref<11x128xf32, #tpu.memory_space<any>> -> memref<1x128xf32, #tpu.memory_space<any>>
    %c7_i32_70 = arith.constant 7 : i32
    %c0_i32_71 = arith.constant 0 : i32
    %86 = tpu.memref_slice %arg4[%c7_i32_70, %c0_i32_71] : memref<8x128xf32, #tpu.memory_space<vmem>> -> memref<1x128xf32, #tpu.memory_space<vmem>>
    %87 = tpu.memref_slice %arg5[%c7_i32_67] : memref<8x!tpu.dma_semaphore, #tpu.memory_space<semaphore_mem>> -> memref<1x!tpu.dma_semaphore, #tpu.memory_space<semaphore_mem>>
    %88 = tpu.memref_squeeze %87 : memref<1x!tpu.dma_semaphore, #tpu.memory_space<semaphore_mem>> -> memref<!tpu.dma_semaphore, #tpu.memory_space<semaphore_mem>>
    tpu.wait_dma2 semaphore(%88 : memref<!tpu.dma_semaphore, #tpu.memory_space<semaphore_mem>>) src(%85 : memref<1x128xf32, #tpu.memory_space<any>>) dst(%86 : memref<1x128xf32, #tpu.memory_space<vmem>>)
    %c0 = arith.constant 0 : index
    %c0_72 = arith.constant 0 : index
    %89 = vector.load %arg4[%c0, %c0_72] : memref<8x128xf32, #tpu.memory_space<vmem>>, vector<8x128xf32>
    %c0_73 = arith.constant 0 : index
    %c0_74 = arith.constant 0 : index
    %90 = vector.load %arg3[%c0_73, %c0_74] : memref<8x128xf32, #tpu.memory_space<vmem>>, vector<8x128xf32>
    tpu.vector_store %arg3[%c0_73, %c0_74], %89 {strides = array<i32>} : memref<8x128xf32, #tpu.memory_space<vmem>>, vector<8x128xf32>,
    return
  }
  func.func @transform_1(%arg0: i32, %arg1: memref<8xi32, #tpu.memory_space<smem>>) -> (i32, i32) {
    %c0_i32 = arith.constant 0 : i32
    %c0_i32_0 = arith.constant 0 : i32
    return %arg0, %c0_i32 : i32, i32
  }
}

</mosaic_0001>

<bundles_post_ra>
// kernel: tpu_custom_call.1
= control target key start
LH: loop header
LB: loop body
LE: loop exit
PB: predicated region body
PF: predicated region fallthrough
CT: control target
= control target key end

     0   :  { %s507_s9 = smov [#allocation5]   ;;  %s660_s0 = inlined_call_operand.hbm [shape: s32[8], index: 0, kind: input, shape index: {}]   ;;  %s661_s1 = inlined_call_operand.hbm [shape: f32[11,128], index: 1, kind: input, shape index: {}]   ;;  %s662_s2 = inlined_call_operand.hbm [shape: f32[8,128], index: 2, kind: output, shape index: {}]  }
   0x1   :  { %8 = dma.hbm_to_smem %s660_s0, 16, %s507_s9, [#allocation4] }
   0x2   :  { %487 = dma.done.wait [#allocation4], 16 }
   0x3   :  { %488 = vsyncadd [#allocation4], 4294967280 }
   0x4   :  { %10 = sfence }
   0x5   :  { %11 = vsyncpa [#allocation7], 0  ;;  %s13_s12 = sld [smem:[#allocation5]]  ;;  %s508_s13 = smov [#allocation2]  }
   0x6   :  { %s23_s14 = sshll.u32 %s508_s13, 4  ;;  %s535_s15 = sld [smem:[#allocation5 + $0x1]]  ;;  %s537_s14 = int_to_ptr.vmem [resolvable:$true] %s23_s14 }
   0x7   :  { %s509_s16 = smov [#allocation2 + $0x1]   ;;  %s539_s18 = sld [smem:[#allocation5 + $0x2]] }
   0x8   :  { %s40_s17 = sshll.u32 %s509_s16, 4  ;;  %s510_s19 = smov [#allocation2 + $0x2]   ;;  %s541_s17 = int_to_ptr.vmem [resolvable:$true] %s40_s17 }
   0x9   :  { %s57_s0 = sshll.u32 %s510_s19, 4  ;;  %s543_s20 = sld [smem:[#allocation5 + $0x3]]  ;;  %s545_s0 = int_to_ptr.vmem [resolvable:$true] %s57_s0 }
   0xa   :  { %s554_s29 = scalar_lea.hbm %s661_s1, 256 }
   0xb   :  { %s250_s21 = sshll.u32 %s13_s12, 4 }
   0xc   :  { %s15_s24 = scalar_lea.hbm %s661_s1, %s250_s21  ;;  %s252_s25 = sshll.u32 %s535_s15, 4 }
   0xd   :  { %s291_s26 = scalar_lea.hbm %s15_s24, 16  ;;  %p294_p1 = scmp.lt.s32.totalorder %s15_s24, %s661_s1 }
   0xe   :  { %p292_p0 = scmp.ne.s32.totalorder %s15_s24, %s291_s26  ;;  %p295_p2 = scmp.lt.s32.totalorder %s554_s29, %s291_s26 }
  0x10   :  { %p296_p3 = por %p295_p2, %p294_p1 }
  0x12   :  { %p297_p4 = pnand %p296_p3, %p292_p0 }
  0x14   :  { %300 = shalt.err (!%p297_p4)  }
  0x15   :  { %s301_s4 = scalar_lea.vmem %s537_s14, 16  ;;  %s563_s5 = scalar_lea.vmem %s537_s14, 128 }
  0x16   :  { %p302_p5 = scmp.ne.s32.totalorder %s537_s14, %s301_s4  ;;  %p306_p6 = scmp.lt.s32.totalorder %s537_s14, %s537_s14 }
  0x17   :  { %p307_p7 = scmp.lt.s32.totalorder %s563_s5, %s301_s4 }
  0x19   :  { %p308_p8 = por %p307_p7, %p306_p6 }
  0x1b   :  { %p309_p9 = pnand %p308_p8, %p302_p5 }
  0x1d   :  { %312 = shalt.err (!%p309_p9)  }
  0x1e   :  { %26 = dma.hbm_to_vmem [thread:$0]  %s15_s24, 16, %s537_s14, [#allocation3] }
  0x1f   :  { %s30_s8 = scalar_lea.hbm %s661_s1, %s252_s25  ;;  %s254_s9 = sshll.u32 %s539_s18, 4 }
  0x20   :  { %s313_s10 = scalar_lea.hbm %s30_s8, 16  ;;  %p316_p11 = scmp.lt.s32.totalorder %s30_s8, %s661_s1 }
  0x21   :  { %p314_p10 = scmp.ne.s32.totalorder %s30_s8, %s313_s10  ;;  %p317_p12 = scmp.lt.s32.totalorder %s554_s29, %s313_s10 }
  0x23   :  { %p318_p13 = por %p317_p12, %p316_p11 }
  0x25   :  { %p319_p0 = pnand %p318_p13, %p314_p10 }
  0x27   :  { %322 = shalt.err (!%p319_p0)  }
  0x28   :  { %s323_s13 = scalar_lea.vmem %s541_s17, 16  ;;  %p328_p2 = scmp.lt.s32.totalorder %s541_s17, %s537_s14 }
  0x29   :  { %p324_p1 = scmp.ne.s32.totalorder %s541_s17, %s323_s13  ;;  %p329_p3 = scmp.lt.s32.totalorder %s563_s5, %s323_s13 }
  0x2b   :  { %p330_p4 = por %p329_p3, %p328_p2 }
  0x2d   :  { %p331_p5 = pnand %p330_p4, %p324_p1 }
  0x2f   :  { %334 = shalt.err (!%p331_p5)  }
  0x30   :  { %43 = dma.hbm_to_vmem [thread:$0]  %s30_s8, 16, %s541_s17, [#allocation3 + $0x1] }
  0x31   :  { %s47_s18 = scalar_lea.hbm %s661_s1, %s254_s9  ;;  %s256_s19 = sshll.u32 %s543_s20, 4 }
  0x32   :  { %s335_s21 = scalar_lea.hbm %s47_s18, 16  ;;  %p338_p7 = scmp.lt.s32.totalorder %s47_s18, %s661_s1 }
  0x33   :  { %p336_p6 = scmp.ne.s32.totalorder %s47_s18, %s335_s21  ;;  %p339_p8 = scmp.lt.s32.totalorder %s554_s29, %s335_s21 }
  0x35   :  { %p340_p9 = por %p339_p8, %p338_p7 }
  0x37   :  { %p341_p10 = pnand %p340_p9, %p336_p6 }
  0x39   :  { %344 = shalt.err (!%p341_p10)  }
  0x3a   :  { %s345_s17 = scalar_lea.vmem %s545_s0, 16  ;;  %p350_p12 = scmp.lt.s32.totalorder %s545_s0, %s537_s14 }
  0x3b   :  { %p346_p11 = scmp.ne.s32.totalorder %s545_s0, %s345_s17  ;;  %p351_p13 = scmp.lt.s32.totalorder %s563_s5, %s345_s17 }
  0x3d   :  { %p352_p0 = por %p351_p13, %p350_p12 }
  0x3f   :  { %p353_p1 = pnand %p352_p0, %p346_p11 }
  0x41   :  { %356 = shalt.err (!%p353_p1)  }
  0x42   :  { %60 = dma.hbm_to_vmem [thread:$0]  %s47_s18, 16, %s545_s0, [#allocation3 + $0x2] }
  0x43   :  { %s64_s25 = scalar_lea.hbm %s661_s1, %s256_s19  ;;  %s511_s26 = smov [#allocation2 + $0x3]  }
  0x44   :  { %s74_s27 = sshll.u32 %s511_s26, 4  ;;  %s257_s28 = sld [smem:[#allocation5 + $0x4]]  ;;  %s75_s27 = int_to_ptr.vmem [resolvable:$true] %s74_s27 }
  0x45   :  { %s357_s30 = scalar_lea.hbm %s64_s25, 16  ;;  %p360_p3 = scmp.lt.s32.totalorder %s64_s25, %s661_s1 }
  0x46   :  { %p358_p2 = scmp.ne.s32.totalorder %s64_s25, %s357_s30  ;;  %p361_p4 = scmp.lt.s32.totalorder %s554_s29, %s357_s30 }
  0x48   :  { %p362_p5 = por %p361_p4, %p360_p3 }
  0x4a   :  { %p363_p6 = pnand %p362_p5, %p358_p2 }
  0x4c   :  { %366 = shalt.err (!%p363_p6)  }
  0x4d   :  { %s367_s6 = scalar_lea.vmem %s75_s27, 16  ;;  %p372_p8 = scmp.lt.s32.totalorder %s75_s27, %s537_s14 }
  0x4e   :  { %p368_p7 = scmp.ne.s32.totalorder %s75_s27, %s367_s6  ;;  %p373_p9 = scmp.lt.s32.totalorder %s563_s5, %s367_s6 }
  0x50   :  { %p374_p10 = por %p373_p9, %p372_p8 }
  0x52   :  { %p375_p11 = pnand %p374_p10, %p368_p7 }
  0x54   :  { %378 = shalt.err (!%p375_p11)  }
  0x55   :  { %77 = dma.hbm_to_vmem [thread:$0]  %s64_s25, 16, %s75_s27, [#allocation3 + $0x3] }
  0x56   :  { %s512_s0 = smov [#allocation2 + $0x4]   ;;  %s259_s8 = sld [smem:[#allocation5 + $0x5]] }
  0x57   :  { %s91_s7 = sshll.u32 %s512_s0, 4  ;;  %s513_s9 = smov [#allocation2 + $0x5]   ;;  %s92_s7 = int_to_ptr.vmem [resolvable:$true] %s91_s7 }
  0x58   :  { %s108_s10 = sshll.u32 %s513_s9, 4  ;;  %s606_s11 = sld [smem:[#allocation5 + $0x6]]  ;;  %s608_s10 = int_to_ptr.vmem [resolvable:$true] %s108_s10 }
  0x59   :  { %s258_s12 = sshll.u32 %s257_s28, 4 }
  0x5a   :  { %s81_s16 = scalar_lea.hbm %s661_s1, %s258_s12 }
  0x5b   :  { %s379_s18 = scalar_lea.hbm %s81_s16, 16  ;;  %p382_p13 = scmp.lt.s32.totalorder %s81_s16, %s661_s1 }
  0x5c   :  { %p380_p12 = scmp.ne.s32.totalorder %s81_s16, %s379_s18  ;;  %p383_p0 = scmp.lt.s32.totalorder %s554_s29, %s379_s18 }
  0x5e   :  { %p384_p1 = por %p383_p0, %p382_p13 }
  0x60   :  { %p385_p2 = pnand %p384_p1, %p380_p12 }
  0x62   :  { %388 = shalt.err (!%p385_p2)  }
  0x63   :  { %s389_s22 = scalar_lea.vmem %s92_s7, 16  ;;  %p394_p4 = scmp.lt.s32.totalorder %s92_s7, %s537_s14 }
  0x64   :  { %p390_p3 = scmp.ne.s32.totalorder %s92_s7, %s389_s22  ;;  %p395_p5 = scmp.lt.s32.totalorder %s563_s5, %s389_s22 }
  0x66   :  { %p396_p6 = por %p395_p5, %p394_p4 }
  0x68   :  { %p397_p7 = pnand %p396_p6, %p390_p3 }
  0x6a   :  { %400 = shalt.err (!%p397_p7)  }
  0x6b   :  { %94 = dma.hbm_to_vmem [thread:$0]  %s81_s16, 16, %s92_s7, [#allocation3 + $0x4] }
  0x6c   :  { %s260_s23 = sshll.u32 %s259_s8, 4  ;;  %s514_s17 = smov [#allocation2 + $0x6]  }
  0x6d   :  { %s125_s20 = sshll.u32 %s514_s17, 4  ;;  %s98_s26 = scalar_lea.hbm %s661_s1, %s260_s23  ;;  %s622_s20 = int_to_ptr.vmem [resolvable:$true] %s125_s20 }
  0x6e   :  { %s401_s27 = scalar_lea.hbm %s98_s26, 16  ;;  %p404_p9 = scmp.lt.s32.totalorder %s98_s26, %s661_s1 }
  0x6f   :  { %p402_p8 = scmp.ne.s32.totalorder %s98_s26, %s401_s27  ;;  %p405_p10 = scmp.lt.s32.totalorder %s554_s29, %s401_s27 }
  0x71   :  { %p406_p11 = por %p405_p10, %p404_p9 }
  0x73   :  { %p407_p12 = pnand %p406_p11, %p402_p8 }
  0x75   :  { %410 = shalt.err (!%p407_p12)  }
  0x76   :  { %s411_s3 = scalar_lea.vmem %s608_s10, 16  ;;  %p416_p0 = scmp.lt.s32.totalorder %s608_s10, %s537_s14 }
  0x77   :  { %p412_p13 = scmp.ne.s32.totalorder %s608_s10, %s411_s3  ;;  %p417_p1 = scmp.lt.s32.totalorder %s563_s5, %s411_s3 }
  0x79   :  { %p418_p2 = por %p417_p1, %p416_p0 }
  0x7b   :  { %p419_p3 = pnand %p418_p2, %p412_p13 }
  0x7d   :  { %422 = shalt.err (!%p419_p3)  }
  0x7e   :  { %111 = dma.hbm_to_vmem [thread:$0]  %s98_s26, 16, %s608_s10, [#allocation3 + $0x5] }
  0x7f   :  { %s262_s4 = sshll.u32 %s606_s11, 4  ;;  %s263_s6 = sld [smem:[#allocation5 + $0x7]] }
  0x80   :  { %s115_s8 = scalar_lea.hbm %s661_s1, %s262_s4 }
  0x81   :  { %s423_s9 = scalar_lea.hbm %s115_s8, 16  ;;  %p426_p5 = scmp.lt.s32.totalorder %s115_s8, %s661_s1 }
  0x82   :  { %p424_p4 = scmp.ne.s32.totalorder %s115_s8, %s423_s9  ;;  %p427_p6 = scmp.lt.s32.totalorder %s554_s29, %s423_s9 }
  0x84   :  { %p428_p7 = por %p427_p6, %p426_p5 }
  0x86   :  { %p429_p8 = pnand %p428_p7, %p424_p4 }
  0x88   :  { %432 = shalt.err (!%p429_p8)  }
  0x89   :  { %s433_s10 = scalar_lea.vmem %s622_s20, 16  ;;  %p438_p10 = scmp.lt.s32.totalorder %s622_s20, %s537_s14 }
  0x8a   :  { %p434_p9 = scmp.ne.s32.totalorder %s622_s20, %s433_s10  ;;  %p439_p11 = scmp.lt.s32.totalorder %s563_s5, %s433_s10 }
  0x8c   :  { %p440_p12 = por %p439_p11, %p438_p10 }
  0x8e   :  { %p441_p13 = pnand %p440_p12, %p434_p9 }
  0x90   :  { %444 = shalt.err (!%p441_p13)  }
  0x91   :  { %128 = dma.hbm_to_vmem [thread:$0]  %s115_s8, 16, %s622_s20, [#allocation3 + $0x6] }
  0x92   :  { %s515_s11 = smov [#allocation2 + $0x7]   ;;  %s264_s16 = sshll.u32 %s263_s6, 4 }
  0x93   :  { %s142_s15 = sshll.u32 %s515_s11, 4  ;;  %s132_s21 = scalar_lea.hbm %s661_s1, %s264_s16  ;;  %s143_s15 = int_to_ptr.vmem [resolvable:$true] %s142_s15 }
  0x94   :  { %s445_s22 = scalar_lea.hbm %s132_s21, 16  ;;  %p448_p1 = scmp.lt.s32.totalorder %s132_s21, %s661_s1 }
  0x95   :  { %p446_p0 = scmp.ne.s32.totalorder %s132_s21, %s445_s22  ;;  %p449_p2 = scmp.lt.s32.totalorder %s554_s29, %s445_s22 }
  0x97   :  { %p450_p3 = por %p449_p2, %p448_p1 }
  0x99   :  { %p451_p4 = pnand %p450_p3, %p446_p0 }
  0x9b   :  { %454 = shalt.err (!%p451_p4)  }
  0x9c   :  { %s455_s24 = scalar_lea.vmem %s143_s15, 16  ;;  %p460_p6 = scmp.lt.s32.totalorder %s143_s15, %s537_s14 }
  0x9d   :  { %p456_p5 = scmp.ne.s32.totalorder %s143_s15, %s455_s24  ;;  %p461_p7 = scmp.lt.s32.totalorder %s563_s5, %s455_s24 }
  0x9f   :  { %p462_p8 = por %p461_p7, %p460_p6 }
  0xa1   :  { %p463_p9 = pnand %p462_p8, %p456_p5 }
  0xa3   :  { %466 = shalt.err (!%p463_p9)  }
  0xa4   :  { %145 = dma.hbm_to_vmem [thread:$0]  %s132_s21, 16, %s143_s15, [#allocation3 + $0x7] }
  0xa5   :  { %489 = dma.done.wait [#allocation3], 16 }
  0xa6   :  { %490 = vsyncadd [#allocation3], 4294967280 }
  0xa7   :  { %491 = dma.done.wait [#allocation3 + $0x1], 16 }
  0xa8   :  { %492 = vsyncadd [#allocation3 + $0x1], 4294967280 }
  0xa9   :  { %493 = dma.done.wait [#allocation3 + $0x2], 16 }
  0xaa   :  { %494 = vsyncadd [#allocation3 + $0x2], 4294967280 }
  0xab   :  { %495 = dma.done.wait [#allocation3 + $0x3], 16 }
  0xac   :  { %496 = vsyncadd [#allocation3 + $0x3], 4294967280 }
  0xad   :  { %497 = dma.done.wait [#allocation3 + $0x4], 16 }
  0xae   :  { %498 = vsyncadd [#allocation3 + $0x4], 4294967280 }
  0xaf   :  { %499 = dma.done.wait [#allocation3 + $0x5], 16 }
  0xb0   :  { %500 = vsyncadd [#allocation3 + $0x5], 4294967280 }
  0xb1   :  { %501 = dma.done.wait [#allocation3 + $0x6], 16 }
  0xb2   :  { %502 = vsyncadd [#allocation3 + $0x6], 4294967280 }
  0xb3   :  { %503 = dma.done.wait [#allocation3 + $0x7], 16 }
  0xb4   :  { %504 = vsyncadd [#allocation3 + $0x7], 4294967280  ;;  %s516_s1 = smov [#allocation6]   ;;  %v163_v0 = vld [vmem:[#allocation2] sm:$0xff] }
  0xb5   :  { %s171_s14 = sshll.u32 %s516_s1, 4  ;;  %164 = vst [vmem:[#allocation6] sm:$0xff] %v163_v0  ;;  %s172_s14 = int_to_ptr.vmem [resolvable:$true] %s171_s14 }
  0xb6   :  { %s467_s29 = scalar_lea.vmem %s172_s14, 128  ;;  %p472_p11 = scmp.lt.s32.totalorder %s172_s14, %s172_s14 }
  0xb7   :  { %p468_p10 = scmp.ne.s32.totalorder %s172_s14, %s467_s29  ;;  %p473_p12 = scmp.lt.s32.totalorder %s467_s29, %s467_s29 }
  0xb9   :  { %p474_p13 = por %p473_p12, %p472_p11 }
  0xbb   :  { %p475_p0 = pnand %p474_p13, %p468_p10 }
  0xbd   :  { %478 = shalt.err (!%p475_p0)
}
  0xbe   :  { %174 = dma.vmem_to_hbm [thread:$0]  %s172_s14, 128, %s662_s2, [#allocation7]  }
  0xbf   :  { %505 = dma.done.wait [#allocation7], 128  }
  0xc0   :  { %506 = vsyncadd [#allocation7], 4294967168 }
  0xc1   :  { %178 = vsyncpa [#allocation7], 1 }
  0xc2   :  { %179 = vsyncmov [#allocation3] }
  0xc5   :  { %s180_s25 = vpop.sfrf %179 }
  0xc6   :  { %p265_p1 = scmp.ne.s32.totalorder %s180_s25, 0 }
  0xc8   :  { %184 = shalt.err (%p265_p1)  }
  0xc9   :  { %186 = vsyncmov [#allocation3 + $0x1] }
  0xcc   :  { %s187_s26 = vpop.sfrf %186 }
  0xcd   :  { %p266_p2 = scmp.ne.s32.totalorder %s187_s26, 0 }
  0xcf   :  { %191 = shalt.err (%p266_p2)  }
  0xd0   :  { %193 = vsyncmov [#allocation3 + $0x2] }
  0xd3   :  { %s194_s27 = vpop.sfrf %193 }
  0xd4   :  { %p267_p3 = scmp.ne.s32.totalorder %s194_s27, 0 }
  0xd6   :  { %198 = shalt.err (%p267_p3)  }
  0xd7   :  { %200 = vsyncmov [#allocation3 + $0x3] }
  0xda   :  { %s201_s28 = vpop.sfrf %200 }
  0xdb   :  { %p268_p4 = scmp.ne.s32.totalorder %s201_s28, 0 }
  0xdd   :  { %205 = shalt.err (%p268_p4)  }
  0xde   :  { %207 = vsyncmov [#allocation3 + $0x4] }
  0xe1   :  { %s208_s2 = vpop.sfrf %207 }
  0xe2   :  { %p269_p5 = scmp.ne.s32.totalorder %s208_s2, 0 }
  0xe4   :  { %212 = shalt.err (%p269_p5)  }
  0xe5   :  { %214 = vsyncmov [#allocation3 + $0x5] }
  0xe8   :  { %s215_s30 = vpop.sfrf %214 }
  0xe9   :  { %p270_p6 = scmp.ne.s32.totalorder %s215_s30, 0 }
  0xeb   :  { %219 = shalt.err (%p270_p6)  }
  0xec   :  { %221 = vsyncmov [#allocation3 + $0x6] }
  0xef   :  { %s222_s3 = vpop.sfrf %221 }
  0xf0   :  { %p271_p7 = scmp.ne.s32.totalorder %s222_s3, 0 }
  0xf2   :  { %226 = shalt.err (%p271_p7)  }
  0xf3   :  { %228 = vsyncmov [#allocation3 + $0x7] }
  0xf6   :  { %s229_s4 = vpop.sfrf %228 }
  0xf7   :  { %p272_p8 = scmp.ne.s32.totalorder %s229_s4, 0 }
  0xf9   :  { %233 = shalt.err (%p272_p8)  }

</bundles_post_ra>
